<compile_context>
chip_gen: v5e
topology: v5e:2x2
jax: 0.10.0
libtpu: 0.0.40
codegen_flags: <defaults>
</compile_context>

<pallas_src>
import functools

import jax
import jax.numpy as jnp
from jax.experimental import pallas as pl
from jax.experimental.pallas import tpu as pltpu


def _conv_stats_kernel(x_ref, w_ref, y_ref, stat_ref, *, gpt, h_out, w_out, cin, cout,
                       ksize):
    """Conv for `gpt` images: 9 accumulated block-diagonal matmuls that directly produce
    the lane-dense (gpt*H, W*Cout) slab block, plus packed one-pass BN partial sums."""
    rows = gpt * h_out
    acc = jnp.zeros((rows, w_out * cout), jnp.float32)
    for t in range(ksize * ksize):
        dh, dw = divmod(t, ksize)
        # Window of the padded input for tap (dh, dw):
        #   rows h+dh, lanes [dw*Cin, (dw+W)*Cin)  ->  (gpt, H, W*Cin)
        tap = x_ref[:, dh:dh + h_out, dw * cin:(dw + w_out) * cin]
        tap = tap.reshape(rows, w_out * cin)
        # Block-diagonal (W*Cin, W*Cout) weight: the MXU result is already in the
        # lane-dense col = w*Cout + c layout (no post-matmul cross-lane relayout).
        acc = acc + jnp.dot(tap, w_ref[t], preferred_element_type=jnp.float32)

    # bf16 slab store: the slab is written once and re-read once, so bf16 halves that
    # HBM round trip. BN statistics below are taken from the fp32 accumulator.
    y_ref[...] = acc.astype(y_ref.dtype)

    # Packed one-pass BN partials (per (w, c) column; the wrapper reduces over tiles and w):
    # row 0 = sum, row 1 = sum of squares.
    stat_ref[0, 0:1, :] = jnp.sum(acc, axis=0, keepdims=True)
    stat_ref[0, 1:2, :] = jnp.sum(acc * acc, axis=0, keepdims=True)


def _bn_gelu_kernel(y_ref, scale_ref, shift_ref, o_ref):
    """Lane-dense elementwise epilogue: y*scale + shift, then exact (erf) GELU.
    Exact erf is kept (nn.GELU() default); on v7x check the VALU slot if this becomes
    the binding unit -- tanh-approx would move the transcendental to the EUP slot."""
    z = y_ref[...].astype(jnp.float32) * scale_ref[...] + shift_ref[...]
    g = 0.5 * z * (1.0 + jax.lax.erf(z * 0.7071067811865475))
    o_ref[...] = g.astype(o_ref.dtype)


def _vmem_limit_bytes():
    """Hardware-derived VMEM limit: ~70% of capacity, capped at 96 MiB (v5e/v6e have
    128 MiB physical; v7x has 64 MiB so this lands well below it)."""
    try:
        cap = int(getattr(pltpu.get_tpu_info(), "vmem_capacity_bytes"))
    except Exception:
        cap = 64 * 1024 * 1024
    return min(int(cap * 0.7), 96 * 1024 * 1024)


def _pick_image_group(n_images, rows_per_image, target_rows):
    """Images per phase-1 grid step: largest divisor of N whose slab-row count stays
    under `target_rows`, keeping >= 2 grid steps when possible so the ("parallel",)
    grid can be split across both v7x TensorCores."""
    best = 1
    for g in range(1, n_images + 1):
        if n_images % g:
            continue
        if g * rows_per_image > target_rows:
            break
        if n_images // g >= 2 or n_images == 1:
            best = g
    return best


def _pick_row_tile(total_rows, target_rows):
    """Phase-2 row tile (decoupled from phase 1): largest multiple-of-8 divisor of
    `total_rows` <= target with >= 2 grid steps; falls back to a single full block.
    # TODO(synk): pad rows to a multiple of 8 instead of the whole-array fallback for
    # large awkward shapes (VMEM pressure on v7x)."""
    best = total_rows
    for r in range(8, min(total_rows, target_rows) + 1, 8):
        if total_rows % r == 0 and total_rows // r >= 2:
            best = r
    return best


def conv_bn_gelu(x_nchw, w_hwio, bias, gamma, beta, *, padding=1, eps=1e-5,
                 target_rows_per_step=4096):
    """Forward of ConvBNGelu2d (square kernel, stride 1, train-mode BatchNorm, exact GELU).

    `bias` is accepted to mirror the PyTorch module's parameters but intentionally unused:
    a per-channel constant added before train-mode BatchNorm is exactly cancelled by the
    mean subtraction (variance unchanged)."""
    del bias
    N, Cin, H, W = x_nchw.shape
    KH, KW, _, Cout = w_hwio.shape
    assert KH == KW and padding == (KH - 1) // 2, "stride-1 'same' conv assumed"
    slab_rows = N * H
    slab_cols = W * Cout

    # ---- wrapper layout plumbing (no 9x im2col materialization) ----
    # NCHW -> padded NHWC -> (N, H+2p, (W+2p)*Cin) bf16; the 3x3 gather happens in-kernel.
    x = jnp.transpose(x_nchw, (0, 2, 3, 1))
    xp = jnp.pad(x, ((0, 0), (padding, padding), (padding, padding), (0, 0)))
    xp = xp.reshape(N, H + 2 * padding, (W + 2 * padding) * Cin).astype(jnp.bfloat16)

    # Per-tap block-diagonal weights (KH*KW, W*Cin, W*Cout):
    #   w_taps[t, w*Cin+ci, w'*Cout+c] = w_hwio[kh, kw, ci, c] if w == w' else 0
    eye_w = jnp.eye(W, dtype=jnp.float32)
    w_taps = jnp.einsum('xy,kcd->kxcyd', eye_w,
                        w_hwio.astype(jnp.float32).reshape(KH * KW, Cin, Cout))
    w_taps = w_taps.reshape(KH * KW, W * Cin, W * Cout).astype(jnp.bfloat16)

    gpt = _pick_image_group(N, H, target_rows_per_step)
    n_steps = N // gpt
    cparams = pltpu.CompilerParams(
        dimension_semantics=("parallel",),
        vmem_limit_bytes=_vmem_limit_bytes())

    # ---- phase 1: conv (block-diagonal matmuls) + packed BN partial sums ----
    # TODO(synk): intra-image h-tiling with halo'd blocks for images whose per-image
    # buffers exceed the VMEM budget (current tiles are whole images).
    kern1 = functools.partial(_conv_stats_kernel, gpt=gpt, h_out=H, w_out=W,
                              cin=Cin, cout=Cout, ksize=KH)
    conv_slab, stats = pl.pallas_call(
        kern1,
        out_shape=(
            jax.ShapeDtypeStruct((slab_rows, slab_cols), jnp.bfloat16),
            jax.ShapeDtypeStruct((n_steps, 2, slab_cols), jnp.float32)),
        grid_spec=pltpu.PrefetchScalarGridSpec(
            num_scalar_prefetch=0,
            grid=(n_steps,),
            in_specs=[
                pl.BlockSpec((gpt, H + 2 * padding, (W + 2 * padding) * Cin),
                             lambda i: (i, 0, 0)),
                pl.BlockSpec((KH * KW, W * Cin, W * Cout), lambda i: (0, 0, 0)),  # resident
            ],
            out_specs=[
                pl.BlockSpec((gpt * H, slab_cols), lambda i: (i, 0)),
                pl.BlockSpec((1, 2, slab_cols), lambda i: (i, 0, 0)),
            ]),
        compiler_params=cparams,
    )(xp, w_taps)

    # ---- glue: finish global BN stats and fold gamma/beta into per-column scale/shift ----
    count = jnp.float32(N * H * W)
    psum = stats[:, 0, :].reshape(-1, W, Cout).sum(axis=(0, 1))     # (Cout,)
    psq = stats[:, 1, :].reshape(-1, W, Cout).sum(axis=(0, 1))      # (Cout,)
    mean = psum / count
    # One-pass variance (E[x^2] - mean^2) from fp32 partials; fine at post-conv magnitudes.
    var = jnp.maximum(psq / count - mean * mean, 0.0)
    scale = gamma.astype(jnp.float32) * jax.lax.rsqrt(var + eps)
    shift = beta.astype(jnp.float32) - mean * scale
    # Tile per-channel vectors into the lane-dense slab column layout (col = w*Cout + c).
    scale_row = jnp.tile(scale, (W,)).reshape(1, slab_cols)
    shift_row = jnp.tile(shift, (W,)).reshape(1, slab_cols)

    # ---- phase 2: normalize + exact GELU over lane-dense slab tiles ----
    rows2 = _pick_row_tile(slab_rows, target_rows_per_step)
    out_slab = pl.pallas_call(
        _bn_gelu_kernel,
        out_shape=jax.ShapeDtypeStruct((slab_rows, slab_cols), x_nchw.dtype),
        grid_spec=pltpu.PrefetchScalarGridSpec(
            num_scalar_prefetch=0,
            grid=(slab_rows // rows2,),
            in_specs=[
                pl.BlockSpec((rows2, slab_cols), lambda i: (i, 0)),
                pl.BlockSpec((1, slab_cols), lambda i: (0, 0)),   # resident scale
                pl.BlockSpec((1, slab_cols), lambda i: (0, 0)),   # resident shift
            ],
            out_specs=pl.BlockSpec((rows2, slab_cols), lambda i: (i, 0))),
        compiler_params=cparams,
    )(conv_slab, scale_row, shift_row)

    # slab row = n*H + h, slab col = w*Cout + c  ->  NHWC  ->  NCHW
    # TODO(synk): fold this NHWC->NCHW transpose into phase-2 out_specs (in-kernel
    # (h,w,c)->(c,h,w) relayout + NCHW-shaped output blocks) to save one output-sized HBM
    # round trip; kept in XLA here to avoid Mosaic transpose-lowering risk.
    out_nhwc = out_slab.reshape(N, H, W, Cout)
    return jnp.transpose(out_nhwc, (0, 3, 1, 2))


def reference(x_nchw, w_hwio, bias, gamma, beta, eps=1e-5):
    """Pure-JAX fp32 reference matching the PyTorch module's forward (training-mode BN)."""
    w_oihw = jnp.transpose(w_hwio, (3, 2, 0, 1))
    out = jax.lax.conv_general_dilated(
        x_nchw, w_oihw, window_strides=(1, 1), padding=((1, 1), (1, 1)),
        dimension_numbers=("NCHW", "OIHW", "NCHW"))
    out = out + bias[None, :, None, None]
    mean = out.mean(axis=(0, 2, 3), keepdims=True)
    var = ((out - mean) ** 2).mean(axis=(0, 2, 3), keepdims=True)
    yn = (out - mean) * jax.lax.rsqrt(var + eps) * gamma[None, :, None, None] \
         + beta[None, :, None, None]
    return jax.nn.gelu(yn, approximate=False)


if __name__ == "__main__":
    # small shapes consistent with the module: batch=2, in_ch=4, out_ch=8, spatial=16
    N, Cin, Cout, H, W = 2, 4, 8, 16, 16
    KH = KW = 3

    key = jax.random.PRNGKey(0)
    kx, kw_, kb, kg, kbe = jax.random.split(key, 5)

    x = jax.random.normal(kx, (N, Cin, H, W), jnp.float32)
    w = jax.random.normal(kw_, (KH, KW, Cin, Cout), jnp.float32) * 0.2  # conv weight (HWIO)
    b = jax.random.normal(kb, (Cout,), jnp.float32) * 0.1               # conv bias
    gamma = 1.0 + 0.1 * jax.random.normal(kg, (Cout,), jnp.float32)     # BN weight
    beta = 0.1 * jax.random.normal(kbe, (Cout,), jnp.float32)           # BN bias

    out = jax.block_until_ready(conv_bn_gelu(x, w, b, gamma, beta))
    ref = jax.block_until_ready(reference(x, w, b, gamma, beta))

    assert out.shape == (N, Cout, H, W)
    # Tolerance covers bf16 MXU operands + the bf16 intermediate slab (fp32 accumulation
    # and fp32 BN statistics) vs the fp32 reference.
    max_err = float(jnp.max(jnp.abs(out - ref)))
    assert jnp.allclose(out, ref, atol=3e-2, rtol=3e-2), \
        f"mismatch vs reference (max |err|={max_err})"

    print("KERNEL_OK")
</pallas_src>

<mosaic_0001>
module attributes {stable_mosaic.version = 11 : i64} {
  func.func @_conv_stats_kernel(%arg0: i32, %arg1: memref<1x18x72xbf16, #tpu.memory_space<vmem>>, %arg2: memref<9x64x128xbf16, #tpu.memory_space<vmem>>, %arg3: memref<16x128xbf16, #tpu.memory_space<vmem>>, %arg4: memref<1x2x128xf32, #tpu.memory_space<vmem>>) attributes {dimension_semantics = [#tpu.dimension_semantics<parallel>], iteration_bounds = array<i64: 2>, scalar_prefetch = 0 : i64, scratch_operands = 0 : i64, tpu.core_type = #tpu.core_type<tc>, window_params = [{transform_indices = @transform_0, window_bounds = array<i64: 1, 18, 72>}, {pipeline_mode = #tpu.pipeline_mode<synchronous>, transform_indices = @transform_1, window_bounds = array<i64: 9, 64, 128>}, {transform_indices = @transform_2, window_bounds = array<i64: 16, 128>}, {transform_indices = @transform_3, window_bounds = array<i64: 1, 2, 128>}]} {
    %cst = arith.constant 0.000000e+00 : f32
    %0 = vector.broadcast %cst : f32 to vector<16x128xf32>
    %c0 = arith.constant 0 : index
    %c0_0 = arith.constant 0 : index
    %c0_1 = arith.constant 0 : index
    %1 = vector.load %arg1[%c0, %c0_0, %c0_1] : memref<1x18x72xbf16, #tpu.memory_space<vmem>>, vector<1x16x64xbf16>
    %2 = vector.shape_cast %1 : vector<1x16x64xbf16> to vector<16x64xbf16>
    %c0_2 = arith.constant 0 : index
    %c0_3 = arith.constant 0 : index
    %c0_4 = arith.constant 0 : index
    %3 = vector.load %arg2[%c0_2, %c0_3, %c0_4] : memref<9x64x128xbf16, #tpu.memory_space<vmem>>, vector<1x64x128xbf16>
    %4 = vector.shape_cast %3 : vector<1x64x128xbf16> to vector<64x128xbf16>
    %cst_5 = arith.constant dense<0.000000e+00> : vector<16x128xf32>
    %5 = tpu.matmul %2, %4, %cst_5 {dimension_numbers = #tpu.dot_dimension_numbers<[1], [0], [0], [1], [0, 0, 1, 1], [], []>} : vector<16x64xbf16>, vector<64x128xbf16>, vector<16x128xf32> -> vector<16x128xf32>
    %6 = arith.addf %0, %5 : vector<16x128xf32>
    %c0_6 = arith.constant 0 : index
    %c0_7 = arith.constant 0 : index
    %c4 = arith.constant 4 : index
    %7 = vector.load %arg1[%c0_6, %c0_7, %c4] : memref<1x18x72xbf16, #tpu.memory_space<vmem>>, vector<1x16x64xbf16>
    %8 = vector.shape_cast %7 : vector<1x16x64xbf16> to vector<16x64xbf16>
    %c1 = arith.constant 1 : index
    %c0_8 = arith.constant 0 : index
    %c0_9 = arith.constant 0 : index
    %9 = vector.load %arg2[%c1, %c0_8, %c0_9] : memref<9x64x128xbf16, #tpu.memory_space<vmem>>, vector<1x64x128xbf16>
    %10 = vector.shape_cast %9 : vector<1x64x128xbf16> to vector<64x128xbf16>
    %cst_10 = arith.constant dense<0.000000e+00> : vector<16x128xf32>
    %11 = tpu.matmul %8, %10, %cst_10 {dimension_numbers = #tpu.dot_dimension_numbers<[1], [0], [0], [1], [0, 0, 1, 1], [], []>} : vector<16x64xbf16>, vector<64x128xbf16>, vector<16x128xf32> -> vector<16x128xf32>
    %12 = arith.addf %6, %11 : vector<16x128xf32>
    %c0_11 = arith.constant 0 : index
    %c0_12 = arith.constant 0 : index
    %c8 = arith.constant 8 : index
    %13 = vector.load %arg1[%c0_11, %c0_12, %c8] : memref<1x18x72xbf16, #tpu.memory_space<vmem>>, vector<1x16x64xbf16>
    %14 = vector.shape_cast %13 : vector<1x16x64xbf16> to vector<16x64xbf16>
    %c2 = arith.constant 2 : index
    %c0_13 = arith.constant 0 : index
    %c0_14 = arith.constant 0 : index
    %15 = vector.load %arg2[%c2, %c0_13, %c0_14] : memref<9x64x128xbf16, #tpu.memory_space<vmem>>, vector<1x64x128xbf16>
    %16 = vector.shape_cast %15 : vector<1x64x128xbf16> to vector<64x128xbf16>
    %cst_15 = arith.constant dense<0.000000e+00> : vector<16x128xf32>
    %17 = tpu.matmul %14, %16, %cst_15 {dimension_numbers = #tpu.dot_dimension_numbers<[1], [0], [0], [1], [0, 0, 1, 1], [], []>} : vector<16x64xbf16>, vector<64x128xbf16>, vector<16x128xf32> -> vector<16x128xf32>
    %18 = arith.addf %12, %17 : vector<16x128xf32>
    %c0_16 = arith.constant 0 : index
    %c1_17 = arith.constant 1 : index
    %c0_18 = arith.constant 0 : index
    %19 = vector.load %arg1[%c0_16, %c1_17, %c0_18] : memref<1x18x72xbf16, #tpu.memory_space<vmem>>, vector<1x16x64xbf16>
    %20 = vector.shape_cast %19 : vector<1x16x64xbf16> to vector<16x64xbf16>
    %c3 = arith.constant 3 : index
    %c0_19 = arith.constant 0 : index
    %c0_20 = arith.constant 0 : index
    %21 = vector.load %arg2[%c3, %c0_19, %c0_20] : memref<9x64x128xbf16, #tpu.memory_space<vmem>>, vector<1x64x128xbf16>
    %22 = vector.shape_cast %21 : vector<1x64x128xbf16> to vector<64x128xbf16>
    %cst_21 = arith.constant dense<0.000000e+00> : vector<16x128xf32>
    %23 = tpu.matmul %20, %22, %cst_21 {dimension_numbers = #tpu.dot_dimension_numbers<[1], [0], [0], [1], [0, 0, 1, 1], [], []>} : vector<16x64xbf16>, vector<64x128xbf16>, vector<16x128xf32> -> vector<16x128xf32>
    %24 = arith.addf %18, %23 : vector<16x128xf32>
    %c0_22 = arith.constant 0 : index
    %c1_23 = arith.constant 1 : index
    %c4_24 = arith.constant 4 : index
    %25 = vector.load %arg1[%c0_22, %c1_23, %c4_24] : memref<1x18x72xbf16, #tpu.memory_space<vmem>>, vector<1x16x64xbf16>
    %26 = vector.shape_cast %25 : vector<1x16x64xbf16> to vector<16x64xbf16>
    %c4_25 = arith.constant 4 : index
    %c0_26 = arith.constant 0 : index
    %c0_27 = arith.constant 0 : index
    %27 = vector.load %arg2[%c4_25, %c0_26, %c0_27] : memref<9x64x128xbf16, #tpu.memory_space<vmem>>, vector<1x64x128xbf16>
    %28 = vector.shape_cast %27 : vector<1x64x128xbf16> to vector<64x128xbf16>
    %cst_28 = arith.constant dense<0.000000e+00> : vector<16x128xf32>
    %29 = tpu.matmul %26, %28, %cst_28 {dimension_numbers = #tpu.dot_dimension_numbers<[1], [0], [0], [1], [0, 0, 1, 1], [], []>} : vector<16x64xbf16>, vector<64x128xbf16>, vector<16x128xf32> -> vector<16x128xf32>
    %30 = arith.addf %24, %29 : vector<16x128xf32>
    %c0_29 = arith.constant 0 : index
    %c1_30 = arith.constant 1 : index
    %c8_31 = arith.constant 8 : index
    %31 = vector.load %arg1[%c0_29, %c1_30, %c8_31] : memref<1x18x72xbf16, #tpu.memory_space<vmem>>, vector<1x16x64xbf16>
    %32 = vector.shape_cast %31 : vector<1x16x64xbf16> to vector<16x64xbf16>
    %c5 = arith.constant 5 : index
    %c0_32 = arith.constant 0 : index
    %c0_33 = arith.constant 0 : index
    %33 = vector.load %arg2[%c5, %c0_32, %c0_33] : memref<9x64x128xbf16, #tpu.memory_space<vmem>>, vector<1x64x128xbf16>
    %34 = vector.shape_cast %33 : vector<1x64x128xbf16> to vector<64x128xbf16>
    %cst_34 = arith.constant dense<0.000000e+00> : vector<16x128xf32>
    %35 = tpu.matmul %32, %34, %cst_34 {dimension_numbers = #tpu.dot_dimension_numbers<[1], [0], [0], [1], [0, 0, 1, 1], [], []>} : vector<16x64xbf16>, vector<64x128xbf16>, vector<16x128xf32> -> vector<16x128xf32>
    %36 = arith.addf %30, %35 : vector<16x128xf32>
    %c0_35 = arith.constant 0 : index
    %c2_36 = arith.constant 2 : index
    %c0_37 = arith.constant 0 : index
    %37 = vector.load %arg1[%c0_35, %c2_36, %c0_37] : memref<1x18x72xbf16, #tpu.memory_space<vmem>>, vector<1x16x64xbf16>
    %38 = vector.shape_cast %37 : vector<1x16x64xbf16> to vector<16x64xbf16>
    %c6 = arith.constant 6 : index
    %c0_38 = arith.constant 0 : index
    %c0_39 = arith.constant 0 : index
    %39 = vector.load %arg2[%c6, %c0_38, %c0_39] : memref<9x64x128xbf16, #tpu.memory_space<vmem>>, vector<1x64x128xbf16>
    %40 = vector.shape_cast %39 : vector<1x64x128xbf16> to vector<64x128xbf16>
    %cst_40 = arith.constant dense<0.000000e+00> : vector<16x128xf32>
    %41 = tpu.matmul %38, %40, %cst_40 {dimension_numbers = #tpu.dot_dimension_numbers<[1], [0], [0], [1], [0, 0, 1, 1], [], []>} : vector<16x64xbf16>, vector<64x128xbf16>, vector<16x128xf32> -> vector<16x128xf32>
    %42 = arith.addf %36, %41 : vector<16x128xf32>
    %c0_41 = arith.constant 0 : index
    %c2_42 = arith.constant 2 : index
    %c4_43 = arith.constant 4 : index
    %43 = vector.load %arg1[%c0_41, %c2_42, %c4_43] : memref<1x18x72xbf16, #tpu.memory_space<vmem>>, vector<1x16x64xbf16>
    %44 = vector.shape_cast %43 : vector<1x16x64xbf16> to vector<16x64xbf16>
    %c7 = arith.constant 7 : index
    %c0_44 = arith.constant 0 : index
    %c0_45 = arith.constant 0 : index
    %45 = vector.load %arg2[%c7, %c0_44, %c0_45] : memref<9x64x128xbf16, #tpu.memory_space<vmem>>, vector<1x64x128xbf16>
    %46 = vector.shape_cast %45 : vector<1x64x128xbf16> to vector<64x128xbf16>
    %cst_46 = arith.constant dense<0.000000e+00> : vector<16x128xf32>
    %47 = tpu.matmul %44, %46, %cst_46 {dimension_numbers = #tpu.dot_dimension_numbers<[1], [0], [0], [1], [0, 0, 1, 1], [], []>} : vector<16x64xbf16>, vector<64x128xbf16>, vector<16x128xf32> -> vector<16x128xf32>
    %48 = arith.addf %42, %47 : vector<16x128xf32>
    %c0_47 = arith.constant 0 : index
    %c2_48 = arith.constant 2 : index
    %c8_49 = arith.constant 8 : index
    %49 = vector.load %arg1[%c0_47, %c2_48, %c8_49] : memref<1x18x72xbf16, #tpu.memory_space<vmem>>, vector<1x16x64xbf16>
    %50 = vector.shape_cast %49 : vector<1x16x64xbf16> to vector<16x64xbf16>
    %c8_50 = arith.constant 8 : index
    %c0_51 = arith.constant 0 : index
    %c0_52 = arith.constant 0 : index
    %51 = vector.load %arg2[%c8_50, %c0_51, %c0_52] : memref<9x64x128xbf16, #tpu.memory_space<vmem>>, vector<1x64x128xbf16>
    %52 = vector.shape_cast %51 : vector<1x64x128xbf16> to vector<64x128xbf16>
    %cst_53 = arith.constant dense<0.000000e+00> : vector<16x128xf32>
    %53 = tpu.matmul %50, %52, %cst_53 {dimension_numbers = #tpu.dot_dimension_numbers<[1], [0], [0], [1], [0, 0, 1, 1], [], []>} : vector<16x64xbf16>, vector<64x128xbf16>, vector<16x128xf32> -> vector<16x128xf32>
    %54 = arith.addf %48, %53 : vector<16x128xf32>
    %55 = arith.truncf %54 : vector<16x128xf32> to vector<16x128xbf16>
    %c0_54 = arith.constant 0 : index
    %c0_55 = arith.constant 0 : index
    %56 = vector.load %arg3[%c0_54, %c0_55] : memref<16x128xbf16, #tpu.memory_space<vmem>>, vector<16x128xbf16>
    tpu.vector_store %arg3[%c0_54, %c0_55], %55 {strides = array<i32>} : memref<16x128xbf16, #tpu.memory_space<vmem>>, vector<16x128xbf16>,
    %cst_56 = arith.constant dense<0.000000e+00> : vector<128xf32>
    %57 = vector.multi_reduction <add>, %54, %cst_56 [0] : vector<16x128xf32> to vector<128xf32>
    %58 = vector.shape_cast %57 : vector<128xf32> to vector<1x128xf32>
    %c0_57 = arith.constant 0 : index
    %c0_58 = arith.constant 0 : index
    %c0_59 = arith.constant 0 : index
    %59 = vector.load %arg4[%c0_57, %c0_58, %c0_59] : memref<1x2x128xf32, #tpu.memory_space<vmem>>, vector<1x1x128xf32>
    %60 = vector.shape_cast %59 : vector<1x1x128xf32> to vector<1x128xf32>
    %61 = vector.shape_cast %58 : vector<1x128xf32> to vector<1x1x128xf32>
    tpu.vector_store %arg4[%c0_57, %c0_58, %c0_59], %61 {strides = array<i32>} : memref<1x2x128xf32, #tpu.memory_space<vmem>>, vector<1x1x128xf32>,
    %62 = arith.mulf %54, %54 : vector<16x128xf32>
    %cst_60 = arith.constant dense<0.000000e+00> : vector<128xf32>
    %63 = vector.multi_reduction <add>, %62, %cst_60 [0] : vector<16x128xf32> to vector<128xf32>
    %64 = vector.shape_cast %63 : vector<128xf32> to vector<1x128xf32>
    %c0_61 = arith.constant 0 : index
    %c1_62 = arith.constant 1 : index
    %c0_63 = arith.constant 0 : index
    %65 = vector.load %arg4[%c0_61, %c1_62, %c0_63] : memref<1x2x128xf32, #tpu.memory_space<vmem>>, vector<1x1x128xf32>
    %66 = vector.shape_cast %65 : vector<1x1x128xf32> to vector<1x128xf32>
    %67 = vector.shape_cast %64 : vector<1x128xf32> to vector<1x1x128xf32>
    tpu.vector_store %arg4[%c0_61, %c1_62, %c0_63], %67 {strides = array<i32>} : memref<1x2x128xf32, #tpu.memory_space<vmem>>, vector<1x1x128xf32>,
    return
  }
  func.func @transform_0(%arg0: i32) -> (i32, i32, i32) {
    %c0_i32 = arith.constant 0 : i32
    %c0_i32_0 = arith.constant 0 : i32
    %c0_i32_1 = arith.constant 0 : i32
    return %arg0, %c0_i32, %c0_i32_0 : i32, i32, i32
  }
  func.func @transform_1(%arg0: i32) -> (i32, i32, i32) {
    %c0_i32 = arith.constant 0 : i32
    %c0_i32_0 = arith.constant 0 : i32
    %c0_i32_1 = arith.constant 0 : i32
    %c0_i32_2 = arith.constant 0 : i32
    return %c0_i32, %c0_i32_0, %c0_i32_1 : i32, i32, i32
  }
  func.func @transform_2(%arg0: i32) -> (i32, i32) {
    %c0_i32 = arith.constant 0 : i32
    %c0_i32_0 = arith.constant 0 : i32
    return %arg0, %c0_i32 : i32, i32
  }
  func.func @transform_3(%arg0: i32) -> (i32, i32, i32) {
    %c0_i32 = arith.constant 0 : i32
    %c0_i32_0 = arith.constant 0 : i32
    %c0_i32_1 = arith.constant 0 : i32
    return %arg0, %c0_i32, %c0_i32_0 : i32, i32, i32
  }
}

</mosaic_0001>

<bundles_post_ra>
// kernel: tpu_custom_call.1
= control target key start
LH: loop header
LB: loop body
LE: loop exit
PB: predicated region body
PF: predicated region fallthrough
CT: control target
= control target key end

     0   :  { %9 = vsyncpa [#allocation3], 0  ;;  %s1452_s0 = inlined_call_operand.vmem [shape: bf16[2,18,72], index: 0, kind: input, shape index: {}]   ;;  %s1453_s1 = inlined_call_operand.hbm [shape: bf16[9,64,128], index: 1, kind: input, shape index: {}]   ;;  %s1454_s2 = inlined_call_operand.hbm [shape: bf16[32,128], index: 2, kind: output, shape index: {0}]   ;;  %s1455_s3 = inlined_call_operand.hbm [shape: f32[2,2,128], index: 3, kind: output, shape index: {1}]  }
   0x1   :  { %10 = vsyncpa [#allocation4], 0 }
   0x2   :  { %12 = vsyncpa [#allocation4 + $0x1], 0 }
   0x3   :  { %13 = vsyncpa [#allocation7], 0 }
   0x4   :  { %15 = vsyncpa [#allocation7 + $0x1], 0  ;;  %s1320_s12 = smov 0   ;;  %s1322_s13 = smov 0  }
   0x5   :  { %s1324_s14 = smov 0   ;;  %s1326_s15 = smov 0  }
   0x6 LB: > { %s1341_s16 = sadd.s32 4294967295, %s1291_s15   ;;  %s878_s17 = sadd.s32 4294967294, %s1291_s15   ;;  %s1291_s15 = sphi %s1326_s15, %s1461_s15   ;;  %s1287_s14 = sphi %s1324_s14, %s1460_s14   ;;  %s1283_s13 = sphi %s1322_s13, %s1459_s13   ;;  %s1279_s12 = sphi %s1320_s12, %s1458_s12  }
   0x7   : > { %s1345_s18 = sadd.s32 1, %s1291_s15   ;;  %s75_s19 = sadd.s32 1, %s1287_s14 }
   0x8   : > { %s72_s20 = ssub.s32 %s1291_s15, %s1345_s18  ;;  %p85_p0 = scmp.ne.s32.totalorder %s1287_s14, %s1283_s13 }
   0x9   : > { %p73_p1 = scmp.eq.s32.totalorder %s72_s20, 0  ;;  %p86_p2 = scmp.eq.s32.totalorder %s1341_s16, 1 }
   0xa   : > { %p91_p3 = scmp.ne.s32.totalorder %s1283_s13, %s1279_s12  ;;  %p92_p4 = scmp.eq.s32.totalorder %s878_s17, 1 }
   0xb   : > { %s1356_s21 = scalar_select %p73_p1, %s1287_s14, %s75_s19  }
   0xc   : > { %p1358_p5 = por %p86_p2, %p85_p0  ;;  %p1362_p6 = por %p92_p4, %p91_p3 }
   0xd   : > { %p879_p7 = scmp.ge.s32.totalorder %s1291_s15, 1  ;;  %p125_p8 = scmp.lt.s32.totalorder %s1291_s15, 3 }
   0xe   : > { %p1121_p9 = scmp.eq.s32.totalorder %s1341_s16, 0  ;;  %s136_s26 = sshll.u32 %s1453_s1, 4  ;;  %s137_s26 = int_to_ptr.hbm [resolvable:$true] %s136_s26 }
   0xf   : > { %p126_p10 = pnand %p879_p7, %p125_p8  ;;  %s1293_s27 = smov [#allocation2]  }
  0x10   : > { %s138_s28 = sshll.u32 %s1293_s27, 4  ;;  %s1294_s29 = smov 64   ;;  %s139_s28 = int_to_ptr.vmem [resolvable:$true] %s138_s28 }
  0x11   : > { %p1110_p11 = pneg %p126_p10  ;;  %s1295_s30 = smov 4  }
  0x12   : > { %162 = sbr.rel (%p126_p10) target bundleno = 338 (0x152), region = 28 }
  0x13   : > { %p1111_p12 = pnand %p1121_p9, %p1110_p11 }
  0x15   : > { %1113 = dma.hbm_to_vmem [thread:$0]  (!%p1111_p12), %s137_s26, 4608, %s139_s28, [#allocation3], %s1294_s29, %s1294_s29, %s1295_s30  }
  0x17   : > { %1266 = dma.done.wait (%p1121_p9), [#allocation3], 4608  }
  0x18   : > { %1268 = vsyncadd (%p1121_p9), [#allocation3], 4294962688  ;;  %p192_p13 = scmp.lt.s32.totalorder %s1341_s16, 1  ;;  %s1296_s9 = smov 124   ;;  %v1059_v6 = vld [vmem:[#allocation2 + $0x38] sm:$0xff]  ;;  %v1058_v13 = vld [vmem:[#allocation2 + $0x30] sm:$0xff] }
  0x19   : > { %v1055_v7 = vld [vmem:[#allocation2 + $0x18] sm:$0xff]  ;;  %257 = vmatpush.bf16.msra.mxu0 %v1059_v6  ;;  %v1054_v14 = vld [vmem:[#allocation2 + $0x10] sm:$0xff]  ;;  %vm382_vm0 = vsmask.f32 7424  ;;  %v1057_v22 = vld [vmem:[#allocation2 + $0x28] sm:$0xff]  ;;  %s1297_s10 = smov 120  }
  0x1a   : > { %s193_s4 = scalar_select %p192_p13, %s1341_s16, 1  ;;  %v1067_v8 = vld [vmem:[#allocation2 + $0x78] sm:$0xff]  ;;  %298 = vmatpush.bf16.msra.mxu1 %v1055_v7  ;;  %v1066_v18 = vld [vmem:[#allocation2 + $0x70] sm:$0xff]  ;;  %v1053_v23 = vld [vmem:[#allocation2 + $0x8] sm:$0xff]  ;;  %vm559_vm1 = vcmask 1046528   ;;  %vm249_vm2 = vcmask 523264  }
  0x1b   : > { %v1063_v15 = vld [vmem:[#allocation2 + $0x58] sm:$0xff]  ;;  %426 = vmatpush.bf16.msra.mxu3 %v1067_v8  ;;  %v1062_v21 = vld [vmem:[#allocation2 + $0x50] sm:$0xff]  ;;  %v1065_v25 = vld [vmem:[#allocation2 + $0x68] sm:$0xff]  ;;  %s1401_s11 = sand.u32 1, %s1283_s13   ;;  %s1088_s17 = sshll.u32 %s1341_s16, 3 }
  0x1c   : > { %s1101_s5 = smul.u32 12, %s193_s4  ;;  %350 = vmatpush.bf16.msra.mxu2 %v1063_v15  ;;  %v1056_v28 = vld [vmem:[#allocation2 + $0x20] sm:$0xff]  ;;  %v1061_v32 = vld [vmem:[#allocation2 + $0x48] sm:$0xff]  ;;  %v1071_v33 = vld [vmem:[#allocation2 + $0x98] sm:$0xff]  ;;  %s884_s19 = sshll.u32 %s1401_s11, 3 }
  0x1d   : > { %258 = vmatpush.bf16.msra.mxu0 %v1058_v13  ;;  %v1052_v29 = vld [vmem:[#allocation2] sm:$0xff]  ;;  %v1075_v34 = vld [vmem:[#allocation2 + $0xb8] sm:$0xff]  ;;  %v1070_v37 = vld [vmem:[#allocation2 + $0x90] sm:$0xff]  ;;  %s753_s25 = scalar_lea.hbm %s1454_s2, %s1088_s17  ;;  %s184_s26 = scalar_lea.vmem [#allocation5], %s884_s19 }
  0x1e   : > { %s196_s8 = scalar_lea.vmem %s1452_s0, %s1101_s5  ;;  %299 = vmatpush.bf16.msra.mxu1 %v1054_v14  ;;  %v1064_v30 = vld [vmem:[#allocation2 + $0x60] sm:$0xff]  ;;  %v1083_v35 = vld [vmem:[#allocation2 + $0xf8] sm:$0xff]  ;;  %v1074_v38 = vld [vmem:[#allocation2 + $0xb0] sm:$0xff]  ;;  %s754_s27 = sshll.u32 %s184_s26, 4  ;;  %s755_s27 = int_to_ptr.vmem [resolvable:$true] %s754_s27 }
  0x1f   : > { %v1051_v0 = vld [vmem:[%s196_s8] sm:$0xff]  ;;  %v364_v2 = vld [vmem:[%s196_s8 + $0x8] sm:$0x1]  ;;  %427 = vmatpush.bf16.msra.mxu3 %v1066_v18  ;;  %v1082_v39 = vld [vmem:[#allocation2 + $0xf0] sm:$0xff]  ;;  %s756_s28 = sshll.u32 %s753_s25, 4  ;;  %s737_s29 = scalar_lea.sflag [#allocation4], %s1401_s11  ;;  %s757_s28 = int_to_ptr.hbm [resolvable:$true] %s756_s28 }
  0x20   : > { %v1090_v1 = vld [vmem:[%s196_s8] sm:$0xff]   ;;  %v379_v3 = vunpack.c.l.b16 %v364_v2  ;;  %223 = vrot.lane.b32.xlu0 %v1051_v0, %s1296_s9  ;;  %351 = vmatpush.bf16.msra.mxu2 %v1062_v21  ;;  %v1079_v40 = vld [vmem:[#allocation2 + $0xd8] sm:$0xff]  ;;  %v1069_v41 = vld [vmem:[#allocation2 + $0x88] sm:$0xff]  ;;  %s1207_s30 = sshra.s32 %s757_s28, 4  ;;  %s1213_s7 = scalar_lea.hbm %s1454_s2, 16  ;;  %s1208_s30 = int_to_ptr.hbm [resolvable:$true] %s1207_s30 }
  0x21   : > { %v384_v4 = vshrl.u32 %v1090_v1, 16  ;;  %v386_v5 = vshll.u32 %v1090_v1, 16  ;;  %v1098_v11 = vld [vmem:[%s196_s8] sm:$0xf0]  ;;  %v1099_v12 = vld [vmem:[%s196_s8] sm:$0xe]  ;;  %259 = vmatpush.bf16.msra.mxu0 %v1057_v22  ;;  %p1214_p3 = scmp.lt.s32.totalorder %s1208_s30, %s1454_s2 }
  0x22   : > { %v381_v9 = vpack.c.b16 %v379_v3, %v379_v3  ;;  %v1100_v20 = vor.u32 %v1099_v12, %v1098_v11  ;;  %300 = vmatpush.bf16.msra.mxu1 %v1053_v23  ;;  %v1060_v36 = vld [vmem:[#allocation2 + $0x40] sm:$0xff]  ;;  %v1073_v42 = vld [vmem:[#allocation2 + $0xa8] sm:$0xff]  ;;  %v1078_v44 = vld [vmem:[#allocation2 + $0xd0] sm:$0xff]  ;;  %s1209_s4 = scalar_lea.hbm %s1208_s30, 8 }
  0x23   : > { %v388_v10 = vrot.slane %v386_v5, 1  ;;  %428 = vmatpush.bf16.msra.mxu3 %v1065_v25  ;;  %v1081_v43 = vld [vmem:[#allocation2 + $0xe8] sm:$0xff]  ;;  %v1068_v45 = vld [vmem:[#allocation2 + $0x80] sm:$0xff]  ;;  %v1087_v51 = vld [vmem:[#allocation2 + $0x118] sm:$0xff]  ;;  %p1210_p0 = scmp.ne.s32.totalorder %s1208_s30, %s1209_s4  ;;  %p1215_p4 = scmp.lt.s32.totalorder %s1213_s7, %s1209_s4 }
  0x24   : > { %v391_v17 = vshll.u32 %v381_v9, 16  ;;  %v560_v26 = vrot.slane %v1100_v20, 1  ;;  %v561_v27 = vrot.slane %v381_v9, 1  ;;  %352 = vmatpush.bf16.msra.mxu2 %v1061_v32  ;;  %v1072_v46 = vld [vmem:[#allocation2 + $0xa0] sm:$0xff]  ;;  %v1077_v48 = vld [vmem:[#allocation2 + $0xc8] sm:$0xff]  ;;  %v1086_v53 = vld [vmem:[#allocation2 + $0x110] sm:$0xff] }
  0x25   : > { %v389_v16 = vor.u32 %v388_v10, %v384_v4  ;;  %260 = vmatpush.bf16.msra.mxu0 %v1056_v28  ;;  %v1080_v47 = vld [vmem:[#allocation2 + $0xe0] sm:$0xff]  ;;  %v1085_v54 = vld [vmem:[#allocation2 + $0x108] sm:$0xff]  ;;  %p1211_p1 = pnand %p1210_p0, %p1358_p5  ;;  %p1216_p7 = por %p1215_p4, %p1214_p3 }
  0x26   : > { %v393_v19 = vrot.slane %v391_v17, 1  ;;  %v1385_v31 = vsel %vm559_vm1, %v560_v26, %v561_v27  ;;  %301 = vmatpush.bf16.msra.mxu1 %v1052_v29  ;;  %v1076_v50 = vld [vmem:[#allocation2 + $0xc0] sm:$0xff] }
  0x27   : > { %429 = vmatpush.bf16.msra.mxu3 %v1064_v30  ;;  %v1084_v57 = vld [vmem:[#allocation2 + $0x100] sm:$0xff]  ;;  %p1212_p2 = pneg %p1211_p1 }
  0x28   : > { %v394_v24 = vsel %vm382_vm0, %v389_v16, %v393_v19  ;;  %317 = vrot.lane.b32.xlu0 %v1051_v0, %s1297_s10  ;;  %353 = vmatpush.bf16.msra.mxu2 %v1060_v36 }
  0x29   : > { %447 = vrot.lane.b32.xlu1 %v394_v24, %s1296_s9  ;;  %501 = vrot.lane.b32.xlu2 %v394_v24, %s1297_s10  ;;  %p1217_p8 = pnand %p1216_p7, %p1212_p2 }
  0x2a   : > { %924 = vmatmul.msk.bf16.vlgmr.msra.gmra.mxu1 %vm249_vm2, %v1051_v0  ;;  %958 = vmatmul.msk.bf16.vlgmr.msra.gmra.mxu3 %vm249_vm2, %v394_v24 }
  0x2b   : > { %480 = vmatpush.bf16.msrb.mxu0 %v1071_v33  ;;  %534 = vmatpush.bf16.msrb.mxu1 %v1075_v34 }
  0x2c   : > { %648 = vmatpush.bf16.msrb.mxu3 %v1083_v35  ;;  %594 = vmatpush.bf16.msrb.mxu2 %v1079_v40 }
  0x2f   : > { %481 = vmatpush.bf16.msrb.mxu0 %v1070_v37  ;;  %535 = vmatpush.bf16.msrb.mxu1 %v1074_v38 }
  0x30   : > { %649 = vmatpush.bf16.msrb.mxu3 %v1082_v39  ;;  %595 = vmatpush.bf16.msrb.mxu2 %v1078_v44 }
  0x31   : > { %615 = vrot.lane.b32.xlu1 %v1385_v31, %s1296_s9  ;;  %669 = vrot.lane.b32.xlu2 %v1385_v31, %s1297_s10 }
  0x33   : > { %482 = vmatpush.bf16.msrb.mxu0 %v1069_v41  ;;  %536 = vmatpush.bf16.msrb.mxu1 %v1073_v42 }
  0x34   : > { %650 = vmatpush.bf16.msrb.mxu3 %v1081_v43  ;;  %596 = vmatpush.bf16.msrb.mxu2 %v1077_v48 }
  0x37   : > { %483 = vmatpush.bf16.msrb.mxu0 %v1068_v45  ;;  %537 = vmatpush.bf16.msrb.mxu1 %v1072_v46 }
  0x38   : > { %651 = vmatpush.bf16.msrb.mxu3 %v1080_v47  ;;  %597 = vmatpush.bf16.msrb.mxu2 %v1076_v50 }
  0x83   : > { %v502_v49 = vpop.permute.xlu2 %501 }
  0x84   : > { %992 = vmatmul.msk.bf16.vlgmr.msrb.gmra.mxu1 %vm249_vm2, %v502_v49 }
  0x8b   : > { %v670_v59 = vpop.permute.xlu2 %669 }
  0x92   : > { %v224_v52 = vpop.permute.xlu0 %223 }
  0x93   : > { %907 = vmatmul.msk.bf16.vlgmr.msra.gmra.mxu0 %vm249_vm2, %v224_v52 }
  0x94   : > { %702 = vmatpush.bf16.msra.mxu0 %v1087_v51 }
  0x98   : > { %703 = vmatpush.bf16.msra.mxu0 %v1086_v53 }
  0x9a   : > { %v318_v55 = vpop.permute.xlu0 %317 }
  0x9b   : > { %v448_v56 = vpop.permute.xlu1 %447  ;;  %941 = vmatmul.msk.bf16.vlgmr.msra.gmra.mxu2 %vm249_vm2, %v318_v55 }
  0x9c   : > { %704 = vmatpush.bf16.msra.mxu0 %v1085_v54 }
  0xa0   : > { %705 = vmatpush.bf16.msra.mxu0 %v1084_v57 }
  0xa3   : > { %v616_v58 = vpop.permute.xlu1 %615  ;;  %975 = vmatmul.msk.bf16.vlgmr.msrb.gmra.mxu0 %vm249_vm2, %v448_v56 }
  0xa4   : > { %1026 = vmatmul.msk.bf16.vlgmr.msrb.gmra.mxu3 %vm249_vm2, %v616_v58 }
  0xa7   : > { %v303_v61 = vpop.f32.mrf.mxu1 }
  0xab   : > { %1009 = vmatmul.msk.bf16.vlgmr.msrb.gmra.mxu2 %vm249_vm2, %v1385_v31 }
  0xad   : > { %v431_v63 = vpop.f32.mrf.mxu3 }
  0xaf   : > { %v305_v3 = vpop.f32.mrf.mxu1 }
  0xb3   : > { %1043 = vmatmul.msk.bf16.vlgmr.msra.gmra.mxu0 %vm249_vm2, %v670_v59 }
  0xb5   : > { %v433_v5 = vpop.f32.mrf.mxu3 }
 0x101   : > { %v539_v11 = vpop.f32.mrf.mxu1 }
 0x109   : > { %v541_v20 = vpop.f32.mrf.mxu1 }
 0x110   : > { %v262_v60 = vpop.f32.mrf.mxu0 }
 0x111   : > { %v304_v2 = vadd.f32 %v303_v61, %v262_v60 }
 0x118   : > { %v264_v62 = vpop.f32.mrf.mxu0 }
 0x119   : > { %v306_v7 = vadd.f32 %v305_v3, %v264_v62 }
 0x11e   : > { %v355_v0 = vpop.f32.mrf.mxu2 }
 0x11f   : > { %v360_v4 = vadd.f32 %v355_v0, %v304_v2 }
 0x120   : > { %v485_v1 = vpop.f32.mrf.mxu0 }
 0x121   : > { %v436_v8 = vadd.f32 %v431_v63, %v360_v4 }
 0x123   : > { %v490_v12 = vadd.f32 %v485_v1, %v436_v8 }
 0x125   : > { %v544_v16 = vadd.f32 %v539_v11, %v490_v12 }
 0x126   : > { %v357_v6 = vpop.f32.mrf.mxu2 }
 0x127   : > { %v361_v10 = vadd.f32 %v357_v6, %v306_v7  ;;  %v653_v14 = vpop.f32.mrf.mxu3 }
 0x128   : > { %v487_v9 = vpop.f32.mrf.mxu0 }
 0x129   : > { %v437_v13 = vadd.f32 %v433_v5, %v361_v10 }
 0x12b   : > { %v491_v18 = vadd.f32 %v487_v9, %v437_v13 }
 0x12d   : > { %v545_v21 = vadd.f32 %v541_v20, %v491_v18 }
 0x12e   : > { %v599_v15 = vpop.f32.mrf.mxu2 }
 0x12f   : > { %v604_v19 = vadd.f32 %v599_v15, %v544_v16  ;;  %v655_v25 = vpop.f32.mrf.mxu3 }
 0x130   : > { %v707_v17 = vpop.f32.mrf.mxu0 }
 0x131   : > { %v658_v22 = vadd.f32 %v653_v14, %v604_v19 }
 0x133   : > { %v712_v26 = vadd.f32 %v707_v17, %v658_v22 }
 0x135   : > { %v726_v30 = vmul.f32 %v712_v26, %v712_v26 }
 0x136   : > { %v601_v23 = vpop.f32.mrf.mxu2 }
 0x137   : > { %v605_v24 = vadd.f32 %v601_v23, %v545_v21 }
 0x138   : > { %v709_v28 = vpop.f32.mrf.mxu0 }
 0x139   : > { %v659_v27 = vadd.f32 %v655_v25, %v605_v24 }
 0x13b   : > { %v713_v29 = vadd.f32 %v709_v28, %v659_v27 }
 0x13d   : > { %v1096_v31 = vpack.c.bf16 %v713_v29, %v712_v26  ;;  %v718_v32 = vadd.f32 %v713_v29, %v712_v26  ;;  %v727_v33 = vmul.f32 %v713_v29, %v713_v29 }
 0x13f   : > { %1097 = vst [vmem:[%s184_s26] sm:$0xff] %v1096_v31   ;;  %v719_v34 = vrot.slane %v718_v32, 4  ;;  %v728_v35 = vadd.f32 %v727_v33, %v726_v30 }
 0x140   : > { %1220 = shalt.err (!%p1217_p8)
}
 0x141   : > { %s1298_s10 = smov 64   ;;  %s1299_s17 = smov 4   ;;  %v720_v36 = vadd.f32 %v719_v34, %v718_v32  ;;  %v729_v37 = vrot.slane %v728_v35, 4 }
 0x142   : > { %1106 = dma.vmem_to_hbm [thread:$0]  (%p1358_p5), %s755_s27, 128, %s757_s28, %s737_s29, %s1298_s10, %s1298_s10, %s1299_s17  }
 0x143   : > { %s885_s19 = sshll.u32 %s1401_s11, 1  ;;  %s1048_s20 = sshll.u32 %s1341_s16, 1  ;;  %v721_v38 = vrot.slane %v720_v36, 2  ;;  %v730_v39 = vadd.f32 %v729_v37, %v728_v35 }
 0x144   : > { %s769_s26 = scalar_lea.hbm %s1455_s3, %s1048_s20  ;;  %s191_s30 = scalar_lea.vmem [#allocation6], %s885_s19 }
 0x145   : > { %v722_v40 = vadd.f32 %v721_v38, %v720_v36  ;;  %v731_v41 = vrot.slane %v730_v39, 2  ;;  %s771_s4 = sshll.u32 %s191_s30, 4  ;;  %s773_s5 = sshll.u32 %s769_s26, 4  ;;  %s772_s4 = int_to_ptr.vmem [resolvable:$true] %s771_s4  ;;  %s774_s5 = int_to_ptr.hbm [resolvable:$true] %s773_s5 }
 0x146   : > { %s742_s16 = scalar_lea.sflag [#allocation7], %s1401_s11  ;;  %s1235_s27 = sshra.s32 %s774_s5, 4  ;;  %s1236_s27 = int_to_ptr.hbm [resolvable:$true] %s1235_s27 }
 0x147   : > { %v723_v42 = vrot.slane %v722_v40, 1  ;;  %v732_v43 = vadd.f32 %v731_v41, %v730_v39  ;;  %s1237_s28 = scalar_lea.hbm %s1236_s27, 2  ;;  %s1241_s7 = scalar_lea.hbm %s1455_s3, 4 }
 0x148   : > { %p1238_p9 = scmp.ne.s32.totalorder %s1236_s27, %s1237_s28  ;;  %p1242_p12 = scmp.lt.s32.totalorder %s1236_s27, %s1455_s3 }
 0x149   : > { %v724_v44 = vadd.f32 %v723_v42, %v722_v40  ;;  %v733_v45 = vrot.slane %v732_v43, 1  ;;  %p1243_p13 = scmp.lt.s32.totalorder %s1241_s7, %s1237_s28 }
 0x14a   : > { %p1239_p10 = pnand %p1238_p9, %p1358_p5 }
 0x14b   : > { %725 = vst [vmem:[%s191_s30] sm:$0x1] %v724_v44  ;;  %v734_v46 = vadd.f32 %v733_v45, %v732_v43  ;;  %p1244_p0 = por %p1243_p13, %p1242_p12 }
 0x14c   : > { %p1240_p11 = pneg %p1239_p10 }
 0x14d   : > { %735 = vst [vmem:[%s191_s30 + $0x1] sm:$0x1] %v734_v46 }
 0x14e   : > { %p1245_p1 = pnand %p1244_p0, %p1240_p11 }
 0x150   : > { %1248 = shalt.err (!%p1245_p1)
}
 0x151   : > { %1107 = dma.vmem_to_hbm [thread:$0]  (%p1358_p5), %s772_s4, 32, %s774_s5, %s742_s16  }
 0x152 PF: > { %p1123_p2 = scmp.ge.s32.totalorder %s1291_s15, 2  ;;  %s785_s11 = sand.u32 1, %s1279_s12  }
 0x153   : > { %s786_s10 = scalar_lea.sflag [#allocation4], %s785_s11 }
 0x154   : > { %p1115_p3 = pnand %p1123_p2, %p1362_p6 }
 0x156   : > { %p1116_p4 = pneg %p1115_p3 }
 0x158   : > { %1270 = dma.done.wait (%p1116_p4), %s786_s10, 128  }
 0x159   : > { %1272 = vsyncadd (%p1116_p4), %s786_s10, 4294967168  ;;  %s796_s17 = scalar_lea.sflag [#allocation7], %s785_s11 }
 0x15a   : > { %1274 = dma.done.wait (%p1116_p4), %s796_s17, 32  }
 0x15b   : > { %1276 = vsyncadd (%p1116_p4), %s796_s17, 4294967264  ;;  %p18_p5 = scmp.ge.s32.totalorder %s1345_s18, 4   ;;  %s1458_s12 = smov %s1283_s13 }
 0x15c   : > { %s1459_s13 = smov %s1287_s14  ;;  %s1460_s14 = smov %s1356_s21 }
 0x15d   : > { %s1461_s15 = smov %s1345_s18  ;;  %20 = sbr.rel (!%p18_p5) target bundleno = 6 (0x6), region = 93 }
 0x162   :  { %802 = vsyncpa [#allocation3], 1 }
 0x163   :  { %804 = vsyncpa [#allocation3 + $0x1], 1 }
 0x164   :  { %805 = vsyncpa [#allocation4], 1 }
 0x165   :  { %807 = vsyncpa [#allocation4 + $0x1], 1 }
 0x166   :  { %808 = vsyncpa [#allocation7], 1 }
 0x167   :  { %810 = vsyncpa [#allocation7 + $0x1], 1 }

</bundles_post_ra>
